<compile_context>
chip_gen: v7x
topology: tpu7x:2x2x1
jax: 0.10.0
libtpu: 0.0.40
codegen_flags: <defaults>
</compile_context>

<pallas_src>
import math
from functools import partial, reduce as _reduce

import jax
import jax.numpy as jnp
from jax.experimental import pallas as pl
from jax.experimental.pallas import tpu as pltpu

LOG_SIG_MAX = 2.0
LOG_SIG_MIN = -10.0
_HALF_LOG_2PI = 0.5 * math.log(2.0 * math.pi)


def _round_up(x, m):
    return ((x + m - 1) // m) * m


def gauss_actor_kernel(x_ref, w1_ref, b1_ref, w2_ref, b2_ref, wp_ref, bp_ref,
                       eps_ref, out_ref, *, n_action, out_width):
    A = n_action
    x = x_ref[...]

    # ---- feature_net: (Linear -> ReLU) x 2  (MXU + VPU) --------------------
    # NOTE(v6e/v7x): operands could be cast to bf16 (keep f32 accumulate) for
    # 2x MXU rate; kept f32 here to preserve the 1e-5 reference tolerance.
    h = jnp.dot(x, w1_ref[...], preferred_element_type=jnp.float32) + b1_ref[...]
    h = jnp.maximum(h, 0.0)
    h = jnp.dot(h, w2_ref[...], preferred_element_type=jnp.float32) + b2_ref[...]
    h = jnp.maximum(h, 0.0)

    # ---- policy_net: single fused (h2, 2A) matmul, static lane split -------
    p = jnp.dot(h, wp_ref[...], preferred_element_type=jnp.float32) + bp_ref[...]
    mu = p[:, :A]
    log_sigma = jnp.clip(p[:, A:], LOG_SIG_MIN, LOG_SIG_MAX)
    sigma = jnp.exp(log_sigma)

    # ---- normal_sample ------------------------------------------------------
    eps = eps_ref[...]
    z = mu + sigma * eps

    # ---- normal_log_prob: (z - mu)/sigma == eps identically -----------------
    log_prob = -0.5 * (eps * eps) - log_sigma - _HALF_LOG_2PI

    # ---- SquashingLayer (Sigmoid) with one shared exp per element -----------
    # e = exp(-|z|) serves both sigmoid(z) and the stable softplus(-z).
    e = jnp.exp(-jnp.abs(z))
    inv_1pe = 1.0 / (1.0 + e)
    action = jnp.where(z >= 0.0, inv_1pe, e * inv_1pe)       # sigmoid(z)
    softplus_neg_z = jnp.log1p(e) + jnp.maximum(-z, 0.0)     # softplus(-z)

    # Fused single XLU reduction:
    #   log_pi - log|detJ| = sum(log_prob) - sum(-z - 2*softplus(-z))
    #                      = sum(log_prob + z + 2*softplus(-z))
    log_pi = jnp.sum(log_prob + z + 2.0 * softplus_neg_z, axis=-1, keepdims=True)

    # ---- single lane-dense output slab: [action | mu | log_sigma | log_pi | 0]
    out_ref[:, 0:A] = action
    out_ref[:, A:2 * A] = mu
    out_ref[:, 2 * A:3 * A] = log_sigma
    out_ref[:, 3 * A:3 * A + 1] = log_pi
    if out_width > 3 * A + 1:  # static pad-zeroing (trace-time branch)
        out_ref[:, 3 * A + 1:] = jnp.zeros(
            (z.shape[0], out_width - (3 * A + 1)), jnp.float32)


def gauss_actor_forward(obs, params, eps, *, batch_tile=512):
    """Runs the whole GaussActor forward in one Pallas invocation.

    Returns (action, log_pi, mu, log_sigma) — i.e. with_log_pi=True outputs.
    """
    B = obs.shape[0]
    x = obs.reshape(B, -1).astype(jnp.float32)
    S = x.shape[1]
    w1, b1, w2, b2, wp, bp = params
    h1, h2 = w1.shape[1], w2.shape[1]
    A = wp.shape[1] // 2

    # Lane-dense packed output width (multiple of 128).
    out_w = max(128, _round_up(3 * A + 1, 128))

    # Sublane-aligned batch tile; pad the batch so the grid tiles it exactly.
    tb = min(batch_tile, _round_up(B, 8))
    b_pad = _round_up(B, tb)
    eps = eps.astype(jnp.float32)
    if b_pad != B:
        x = jnp.pad(x, ((0, b_pad - B), (0, 0)))
        eps = jnp.pad(eps, ((0, b_pad - B), (0, 0)))

    grid = (b_pad // tb,)

    def row_spec(last):                       # batch-tiled arrays
        return pl.BlockSpec((tb, last), lambda i: (i, 0))

    def const_spec(a):                        # VMEM-resident params
        return pl.BlockSpec(a.shape, lambda i: (0,) * a.ndim)

    cost = pl.CostEstimate(
        flops=2 * b_pad * (S * h1 + h1 * h2 + h2 * 2 * A) + 30 * b_pad * A,
        transcendentals=3 * b_pad * A,
        bytes_accessed=4 * (b_pad * (S + A + out_w)
                            + w1.size + b1.size + w2.size + b2.size
                            + wp.size + bp.size),
    )

    out = pl.pallas_call(
        partial(gauss_actor_kernel, n_action=A, out_width=out_w),
        grid=grid,
        in_specs=[row_spec(S),
                  const_spec(w1), const_spec(b1),
                  const_spec(w2), const_spec(b2),
                  const_spec(wp), const_spec(bp),
                  row_spec(A)],
        out_specs=row_spec(out_w),
        out_shape=jax.ShapeDtypeStruct((b_pad, out_w), jnp.float32),
        compiler_params=pltpu.CompilerParams(
            dimension_semantics=("parallel",)),  # shard batch tiles across TCs (v7x)
        cost_estimate=cost,
    )(x, w1, b1, w2, b2, wp, bp, eps)

    out = out[:B]
    action = out[:, 0:A]
    mu = out[:, A:2 * A]
    log_sigma = out[:, 2 * A:3 * A]
    log_pi = out[:, 3 * A:3 * A + 1]
    return action, log_pi, mu, log_sigma


def init_params(key, state_size, hiddens, action_size):
    """Deterministic synthetic init (Kaiming-ish hidden, small uniform head)."""
    ks = jax.random.split(key, 4)
    h1, h2 = hiddens
    w1 = jax.random.normal(ks[0], (state_size, h1), jnp.float32) * math.sqrt(2.0 / state_size)
    b1 = jnp.zeros((1, h1), jnp.float32)
    w2 = jax.random.normal(ks[1], (h1, h2), jnp.float32) * math.sqrt(2.0 / h1)
    b2 = jnp.zeros((1, h2), jnp.float32)
    # policy_net output init ("out_init" ~ small uniform), fused [mu | log_sigma]
    wp = jax.random.uniform(ks[2], (h2, 2 * action_size), jnp.float32, -3e-3, 3e-3)
    bp = jax.random.uniform(ks[3], (1, 2 * action_size), jnp.float32, -3e-3, 3e-3)
    return (w1, b1, w2, b2, wp, bp)


def reference_forward(obs, params, eps):
    """Pure-JAX reference of the same forward pass (for validation)."""
    B = obs.shape[0]
    x = obs.reshape(B, -1)
    w1, b1, w2, b2, wp, bp = params
    A = wp.shape[1] // 2
    h = jnp.maximum(x @ w1 + b1, 0.0)
    h = jnp.maximum(h @ w2 + b2, 0.0)
    p = h @ wp + bp
    mu = p[:, :A]
    log_sigma = jnp.clip(p[:, A:], LOG_SIG_MIN, LOG_SIG_MAX)
    sigma = jnp.exp(log_sigma)
    z = mu + sigma * eps
    log_prob = -0.5 * ((z - mu) / sigma) ** 2 - log_sigma - _HALF_LOG_2PI
    log_pi = jnp.sum(log_prob, axis=-1, keepdims=True)
    log_det = jnp.sum(-z - 2.0 * jax.nn.softplus(-z), axis=-1, keepdims=True)
    action = jax.nn.sigmoid(z)
    return action, log_pi - log_det, mu, log_sigma


if __name__ == "__main__":
    # GaussActor(state_shape=(4, 8, 8), action_size=8, hiddens=[64, 32],
    #            layer_fn=nn.Linear, activation_fn=nn.ReLU,
    #            out_activation=nn.Sigmoid)
    B = 2
    state_shape = (4, 8, 8)                      # (C, H, W)
    state_size = _reduce(lambda a, b: a * b, state_shape)
    hiddens = [64, 32]
    action_size = 8

    key = jax.random.PRNGKey(0)
    k_obs, k_eps, k_par = jax.random.split(key, 3)

    obs = jax.random.normal(k_obs, (B,) + state_shape, jnp.float32)   # NCHW
    eps = jax.random.normal(k_eps, (B, action_size), jnp.float32)     # N(0,1) noise
    params = init_params(k_par, state_size, hiddens, action_size)

    action, log_pi, mu, log_sigma = gauss_actor_forward(obs, params, eps)
    jax.block_until_ready(action)

    # sanity check against pure-JAX reference
    ref = reference_forward(obs, params, eps)
    for got, want in zip((action, log_pi, mu, log_sigma), ref):
        assert got.shape == want.shape, "shape mismatch vs reference"
        assert jnp.allclose(got, want, atol=1e-5, rtol=1e-5), "mismatch vs reference"

    print("KERNEL_OK")
</pallas_src>

<mosaic_0001>
module attributes {stable_mosaic.version = 11 : i64} {
  func.func @gauss_actor_kernel(%arg0: i32, %arg1: memref<8x256xf32, #tpu.memory_space<vmem>>, %arg2: memref<256x64xf32, #tpu.memory_space<vmem>>, %arg3: memref<1x64xf32, #tpu.memory_space<vmem>>, %arg4: memref<64x32xf32, #tpu.memory_space<vmem>>, %arg5: memref<1x32xf32, #tpu.memory_space<vmem>>, %arg6: memref<32x16xf32, #tpu.memory_space<vmem>>, %arg7: memref<1x16xf32, #tpu.memory_space<vmem>>, %arg8: memref<8x8xf32, #tpu.memory_space<vmem>>, %arg9: memref<8x128xf32, #tpu.memory_space<vmem>>) attributes {dimension_semantics = [#tpu.dimension_semantics<parallel>], iteration_bounds = array<i64: 1>, scalar_prefetch = 0 : i64, scratch_operands = 0 : i64, tpu.core_type = #tpu.core_type<tc>, window_params = [{transform_indices = @transform_0, window_bounds = array<i64: 8, 256>}, {pipeline_mode = #tpu.pipeline_mode<synchronous>, transform_indices = @transform_1, window_bounds = array<i64: 256, 64>}, {pipeline_mode = #tpu.pipeline_mode<synchronous>, transform_indices = @transform_2, window_bounds = array<i64: 1, 64>}, {pipeline_mode = #tpu.pipeline_mode<synchronous>, transform_indices = @transform_3, window_bounds = array<i64: 64, 32>}, {pipeline_mode = #tpu.pipeline_mode<synchronous>, transform_indices = @transform_4, window_bounds = array<i64: 1, 32>}, {pipeline_mode = #tpu.pipeline_mode<synchronous>, transform_indices = @transform_5, window_bounds = array<i64: 32, 16>}, {pipeline_mode = #tpu.pipeline_mode<synchronous>, transform_indices = @transform_6, window_bounds = array<i64: 1, 16>}, {transform_indices = @transform_7, window_bounds = array<i64: 8, 8>}, {transform_indices = @transform_8, window_bounds = array<i64: 8, 128>}]} {
    %c0 = arith.constant 0 : index
    %c0_0 = arith.constant 0 : index
    %0 = vector.load %arg1[%c0, %c0_0] : memref<8x256xf32, #tpu.memory_space<vmem>>, vector<8x256xf32>
    %c0_1 = arith.constant 0 : index
    %c0_2 = arith.constant 0 : index
    %1 = vector.load %arg2[%c0_1, %c0_2] : memref<256x64xf32, #tpu.memory_space<vmem>>, vector<256x64xf32>
    %cst = arith.constant dense<0.000000e+00> : vector<8x64xf32>
    %2 = tpu.matmul %0, %1, %cst {dimension_numbers = #tpu.dot_dimension_numbers<[1], [0], [0], [1], [0, 0, 1, 1], [], []>} : vector<8x256xf32>, vector<256x64xf32>, vector<8x64xf32> -> vector<8x64xf32>
    %c0_3 = arith.constant 0 : index
    %c0_4 = arith.constant 0 : index
    %3 = vector.load %arg3[%c0_3, %c0_4] : memref<1x64xf32, #tpu.memory_space<vmem>>, vector<1x64xf32>
    %4 = vector.broadcast %3 : vector<1x64xf32> to vector<8x64xf32>
    %5 = arith.addf %2, %4 : vector<8x64xf32>
    %cst_5 = arith.constant 0.000000e+00 : f32
    %6 = vector.broadcast %cst_5 : f32 to vector<8x64xf32>
    %7 = arith.maximumf %5, %6 : vector<8x64xf32>
    %c0_6 = arith.constant 0 : index
    %c0_7 = arith.constant 0 : index
    %8 = vector.load %arg4[%c0_6, %c0_7] : memref<64x32xf32, #tpu.memory_space<vmem>>, vector<64x32xf32>
    %cst_8 = arith.constant dense<0.000000e+00> : vector<8x32xf32>
    %9 = tpu.matmul %7, %8, %cst_8 {dimension_numbers = #tpu.dot_dimension_numbers<[1], [0], [0], [1], [0, 0, 1, 1], [], []>} : vector<8x64xf32>, vector<64x32xf32>, vector<8x32xf32> -> vector<8x32xf32>
    %c0_9 = arith.constant 0 : index
    %c0_10 = arith.constant 0 : index
    %10 = vector.load %arg5[%c0_9, %c0_10] : memref<1x32xf32, #tpu.memory_space<vmem>>, vector<1x32xf32>
    %11 = vector.broadcast %10 : vector<1x32xf32> to vector<8x32xf32>
    %12 = arith.addf %9, %11 : vector<8x32xf32>
    %cst_11 = arith.constant 0.000000e+00 : f32
    %13 = vector.broadcast %cst_11 : f32 to vector<8x32xf32>
    %14 = arith.maximumf %12, %13 : vector<8x32xf32>
    %c0_12 = arith.constant 0 : index
    %c0_13 = arith.constant 0 : index
    %15 = vector.load %arg6[%c0_12, %c0_13] : memref<32x16xf32, #tpu.memory_space<vmem>>, vector<32x16xf32>
    %cst_14 = arith.constant dense<0.000000e+00> : vector<8x16xf32>
    %16 = tpu.matmul %14, %15, %cst_14 {dimension_numbers = #tpu.dot_dimension_numbers<[1], [0], [0], [1], [0, 0, 1, 1], [], []>} : vector<8x32xf32>, vector<32x16xf32>, vector<8x16xf32> -> vector<8x16xf32>
    %c0_15 = arith.constant 0 : index
    %c0_16 = arith.constant 0 : index
    %17 = vector.load %arg7[%c0_15, %c0_16] : memref<1x16xf32, #tpu.memory_space<vmem>>, vector<1x16xf32>
    %18 = vector.broadcast %17 : vector<1x16xf32> to vector<8x16xf32>
    %19 = arith.addf %16, %18 : vector<8x16xf32>
    %20 = vector.extract_strided_slice %19 {offsets = [0, 0], sizes = [8, 8], strides = [1, 1]} : vector<8x16xf32> to vector<8x8xf32>
    %21 = vector.extract_strided_slice %19 {offsets = [0, 8], sizes = [8, 8], strides = [1, 1]} : vector<8x16xf32> to vector<8x8xf32>
    %cst_17 = arith.constant -1.000000e+01 : f32
    %cst_18 = arith.constant 2.000000e+00 : f32
    %22 = vector.broadcast %cst_17 : f32 to vector<8x8xf32>
    %23 = arith.maximumf %22, %21 : vector<8x8xf32>
    %24 = vector.broadcast %cst_18 : f32 to vector<8x8xf32>
    %25 = arith.minimumf %24, %23 : vector<8x8xf32>
    %26 = math.exp %25 : vector<8x8xf32>
    %c0_19 = arith.constant 0 : index
    %c0_20 = arith.constant 0 : index
    %27 = vector.load %arg8[%c0_19, %c0_20] : memref<8x8xf32, #tpu.memory_space<vmem>>, vector<8x8xf32>
    %28 = arith.mulf %26, %27 : vector<8x8xf32>
    %29 = arith.addf %20, %28 : vector<8x8xf32>
    %30 = arith.mulf %27, %27 : vector<8x8xf32>
    %cst_21 = arith.constant -5.000000e-01 : f32
    %31 = vector.broadcast %cst_21 : f32 to vector<8x8xf32>
    %32 = arith.mulf %31, %30 : vector<8x8xf32>
    %33 = arith.subf %32, %25 : vector<8x8xf32>
    %cst_22 = arith.constant 0.918938517 : f32
    %34 = vector.broadcast %cst_22 : f32 to vector<8x8xf32>
    %35 = arith.subf %33, %34 : vector<8x8xf32>
    %36 = math.absf %29 : vector<8x8xf32>
    %cst_23 = arith.constant 0.000000e+00 : f32
    %37 = vector.broadcast %cst_23 : f32 to vector<8x8xf32>
    %38 = arith.subf %37, %36 : vector<8x8xf32>
    %39 = math.exp %38 : vector<8x8xf32>
    %cst_24 = arith.constant 1.000000e+00 : f32
    %40 = vector.broadcast %cst_24 : f32 to vector<8x8xf32>
    %41 = arith.addf %40, %39 : vector<8x8xf32>
    %cst_25 = arith.constant 1.000000e+00 : f32
    %42 = vector.broadcast %cst_25 : f32 to vector<8x8xf32>
    %43 = arith.divf %42, %41 : vector<8x8xf32>
    %cst_26 = arith.constant 0.000000e+00 : f32
    %44 = vector.broadcast %cst_26 : f32 to vector<8x8xf32>
    %45 = arith.cmpf oge, %29, %44 : vector<8x8xf32>
    %46 = arith.mulf %39, %43 : vector<8x8xf32>
    %47 = arith.select %45, %43, %46 : vector<8x8xi1>, vector<8x8xf32>
    %48 = math.log1p %39 : vector<8x8xf32>
    %cst_27 = arith.constant 0.000000e+00 : f32
    %49 = vector.broadcast %cst_27 : f32 to vector<8x8xf32>
    %50 = arith.subf %49, %29 : vector<8x8xf32>
    %cst_28 = arith.constant 0.000000e+00 : f32
    %51 = vector.broadcast %cst_28 : f32 to vector<8x8xf32>
    %52 = arith.maximumf %50, %51 : vector<8x8xf32>
    %53 = arith.addf %48, %52 : vector<8x8xf32>
    %54 = arith.addf %35, %29 : vector<8x8xf32>
    %cst_29 = arith.constant 2.000000e+00 : f32
    %55 = vector.broadcast %cst_29 : f32 to vector<8x8xf32>
    %56 = arith.mulf %55, %53 : vector<8x8xf32>
    %57 = arith.addf %54, %56 : vector<8x8xf32>
    %cst_30 = arith.constant dense<0.000000e+00> : vector<8xf32>
    %58 = vector.multi_reduction <add>, %57, %cst_30 [1] : vector<8x8xf32> to vector<8xf32>
    %59 = vector.shape_cast %58 : vector<8xf32> to vector<8x1xf32>
    %c0_31 = arith.constant 0 : index
    %c0_32 = arith.constant 0 : index
    %60 = vector.load %arg9[%c0_31, %c0_32] : memref<8x128xf32, #tpu.memory_space<vmem>>, vector<8x8xf32>
    tpu.vector_store %arg9[%c0_31, %c0_32], %47 {strides = array<i32>} : memref<8x128xf32, #tpu.memory_space<vmem>>, vector<8x8xf32>,
    %c0_33 = arith.constant 0 : index
    %c8 = arith.constant 8 : index
    %61 = vector.load %arg9[%c0_33, %c8] : memref<8x128xf32, #tpu.memory_space<vmem>>, vector<8x8xf32>
    tpu.vector_store %arg9[%c0_33, %c8], %20 {strides = array<i32>} : memref<8x128xf32, #tpu.memory_space<vmem>>, vector<8x8xf32>,
    %c0_34 = arith.constant 0 : index
    %c16 = arith.constant 16 : index
    %62 = vector.load %arg9[%c0_34, %c16] : memref<8x128xf32, #tpu.memory_space<vmem>>, vector<8x8xf32>
    tpu.vector_store %arg9[%c0_34, %c16], %25 {strides = array<i32>} : memref<8x128xf32, #tpu.memory_space<vmem>>, vector<8x8xf32>,
    %c0_35 = arith.constant 0 : index
    %c24 = arith.constant 24 : index
    %63 = vector.load %arg9[%c0_35, %c24] : memref<8x128xf32, #tpu.memory_space<vmem>>, vector<8x1xf32>
    tpu.vector_store %arg9[%c0_35, %c24], %59 {strides = array<i32>} : memref<8x128xf32, #tpu.memory_space<vmem>>, vector<8x1xf32>,
    %cst_36 = arith.constant 0.000000e+00 : f32
    %64 = vector.broadcast %cst_36 : f32 to vector<8x103xf32>
    %c0_37 = arith.constant 0 : index
    %c25 = arith.constant 25 : index
    %65 = vector.load %arg9[%c0_37, %c25] : memref<8x128xf32, #tpu.memory_space<vmem>>, vector<8x103xf32>
    tpu.vector_store %arg9[%c0_37, %c25], %64 {strides = array<i32>} : memref<8x128xf32, #tpu.memory_space<vmem>>, vector<8x103xf32>,
    return
  }
  func.func @transform_0(%arg0: i32) -> (i32, i32) {
    %c0_i32 = arith.constant 0 : i32
    %c0_i32_0 = arith.constant 0 : i32
    return %arg0, %c0_i32 : i32, i32
  }
  func.func @transform_1(%arg0: i32) -> (i32, i32) {
    %c0_i32 = arith.constant 0 : i32
    %c0_i32_0 = arith.constant 0 : i32
    %c0_i32_1 = arith.constant 0 : i32
    return %c0_i32, %c0_i32_0 : i32, i32
  }
  func.func @transform_2(%arg0: i32) -> (i32, i32) {
    %c0_i32 = arith.constant 0 : i32
    %c0_i32_0 = arith.constant 0 : i32
    %c0_i32_1 = arith.constant 0 : i32
    return %c0_i32, %c0_i32_0 : i32, i32
  }
  func.func @transform_3(%arg0: i32) -> (i32, i32) {
    %c0_i32 = arith.constant 0 : i32
    %c0_i32_0 = arith.constant 0 : i32
    %c0_i32_1 = arith.constant 0 : i32
    return %c0_i32, %c0_i32_0 : i32, i32
  }
  func.func @transform_4(%arg0: i32) -> (i32, i32) {
    %c0_i32 = arith.constant 0 : i32
    %c0_i32_0 = arith.constant 0 : i32
    %c0_i32_1 = arith.constant 0 : i32
    return %c0_i32, %c0_i32_0 : i32, i32
  }
  func.func @transform_5(%arg0: i32) -> (i32, i32) {
    %c0_i32 = arith.constant 0 : i32
    %c0_i32_0 = arith.constant 0 : i32
    %c0_i32_1 = arith.constant 0 : i32
    return %c0_i32, %c0_i32_0 : i32, i32
  }
  func.func @transform_6(%arg0: i32) -> (i32, i32) {
    %c0_i32 = arith.constant 0 : i32
    %c0_i32_0 = arith.constant 0 : i32
    %c0_i32_1 = arith.constant 0 : i32
    return %c0_i32, %c0_i32_0 : i32, i32
  }
  func.func @transform_7(%arg0: i32) -> (i32, i32) {
    %c0_i32 = arith.constant 0 : i32
    %c0_i32_0 = arith.constant 0 : i32
    return %arg0, %c0_i32 : i32, i32
  }
  func.func @transform_8(%arg0: i32) -> (i32, i32) {
    %c0_i32 = arith.constant 0 : i32
    %c0_i32_0 = arith.constant 0 : i32
    return %arg0, %c0_i32 : i32, i32
  }
}

</mosaic_0001>

<bundles_post_ra>
// kernel: tpu_custom_call.1
= control target key start
LH: loop header
LB: loop body
LE: loop exit
PB: predicated region body
PF: predicated region fallthrough
CT: control target
= control target key end

     0   :  { %v572_v7 = vmov 0.0|0.0   ;;  %s796_s0 = inlined_call_operand.vmem [shape: f32[8,256], index: 0, kind: input, shape index: {}]   ;;  %s797_s1 = inlined_call_operand.vmem [shape: f32[256,64], index: 1, kind: input, shape index: {}]   ;;  %s798_s2 = inlined_call_operand.vmem [shape: f32[1,64], index: 2, kind: input, shape index: {}]   ;;  %s799_s3 = inlined_call_operand.vmem [shape: f32[64,32], index: 3, kind: input, shape index: {}]   ;;  %s800_s4 = inlined_call_operand.vmem [shape: f32[1,32], index: 4, kind: input, shape index: {}]   ;;  %s801_s5 = inlined_call_operand.vmem [shape: f32[32,16], index: 5, kind: input, shape index: {}]   ;;  %s802_s6 = inlined_call_operand.vmem [shape: f32[1,16], index: 6, kind: input, shape index: {}]   ;;  %s803_s7 = inlined_call_operand.vmem [shape: f32[8,8], index: 7, kind: input, shape index: {}]   ;;  %s804_s8 = inlined_call_operand.hbm [shape: f32[8,128], index: 8, kind: output, shape index: {}]  }
   0x1   :  { %v48_v0 = vld [vmem:[%s797_s1 + $0x80] sm:$0xff]  ;;  %v49_v1 = vld [vmem:[%s797_s1 + $0x88] sm:$0xff]  ;;  %v50_v5 = vld [vmem:[%s797_s1 + $0x90] sm:$0xff]  ;;  %516 = vmatprep.subr.bf16.mxu1 %v572_v7 }
   0x2   :  { %v32_v2 = vld [vmem:[%s797_s1] sm:$0xff]  ;;  %v484_v3 = vpack.c.bf16 %v49_v1, %v48_v0  ;;  %v33_v4 = vld [vmem:[%s797_s1 + $0x8] sm:$0xff]  ;;  %v51_v6 = vld [vmem:[%s797_s1 + $0x98] sm:$0xff] }
   0x3   :  { %v486_v8 = vpack.c.bf16 %v33_v4, %v32_v2  ;;  %v488_v9 = vpack.c.bf16 %v51_v6, %v50_v5  ;;  %v34_v10 = vld [vmem:[%s797_s1 + $0x10] sm:$0xff]  ;;  %v35_v11 = vld [vmem:[%s797_s1 + $0x18] sm:$0xff]  ;;  %v52_v12 = vld [vmem:[%s797_s1 + $0xa0] sm:$0xff] }
   0x4   :  { %485 = vmatprep.subr.bf16.mxu0 %v484_v3  ;;  %v53_v13 = vld [vmem:[%s797_s1 + $0xa8] sm:$0xff]  ;;  %v490_v14 = vpack.c.bf16 %v35_v11, %v34_v10  ;;  %v36_v16 = vld [vmem:[%s797_s1 + $0x20] sm:$0xff]  ;;  %v54_v18 = vld [vmem:[%s797_s1 + $0xb0] sm:$0xff] }
   0x5   :  { %487 = vmatpush3.bf16.msra.mxu0 %v486_v8  ;;  %v492_v15 = vpack.c.bf16 %v53_v13, %v52_v12  ;;  %v37_v17 = vld [vmem:[%s797_s1 + $0x28] sm:$0xff]  ;;  %v55_v19 = vld [vmem:[%s797_s1 + $0xb8] sm:$0xff]  ;;  %v38_v22 = vld [vmem:[%s797_s1 + $0x30] sm:$0xff] }
   0x6   :  { %489 = vmatprep.subr.bf16.mxu0 %v488_v9  ;;  %v494_v20 = vpack.c.bf16 %v37_v17, %v36_v16  ;;  %v496_v21 = vpack.c.bf16 %v55_v19, %v54_v18  ;;  %v39_v23 = vld [vmem:[%s797_s1 + $0x38] sm:$0xff]  ;;  %v56_v24 = vld [vmem:[%s797_s1 + $0xc0] sm:$0xff]  ;;  %v57_v25 = vld [vmem:[%s797_s1 + $0xc8] sm:$0xff] }
   0x7   :  { %v31_v26 = vld [vmem:[%s796_s0 + $0x8] sm:$0xff]  ;;  %v142_v27 = vld [vmem:[%s799_s3] sm:$0xff]  ;;  %v498_v29 = vpack.c.bf16 %v39_v23, %v38_v22  ;;  %v144_v31 = vld [vmem:[%s799_s3 + $0x10] sm:$0xff] }
   0x8   :  { %135 = vmatprep.mubr.f32.mxu0 %v31_v26  ;;  %v143_v28 = vld [vmem:[%s799_s3 + $0x8] sm:$0xff]  ;;  %v145_v32 = vld [vmem:[%s799_s3 + $0x18] sm:$0xff] }
   0x9   :  { %491 = vmatpush3.bf16.msra.mxu0 %v490_v14  ;;  %v517_v30 = vpack.c.bf16 %v143_v28, %v142_v27 }
   0xa   :  { %493 = vmatprep.subr.bf16.mxu0 %v492_v15 }
   0xd   :  { %495 = vmatpush3.bf16.msra.mxu0 %v494_v20 }
   0xe   :  { %13 = vsyncpa [#allocation3], 0  ;;  %497 = vmatprep.subr.bf16.mxu0 %v496_v21  ;;  %v500_v33 = vpack.c.bf16 %v57_v25, %v56_v24  ;;  %v40_v34 = vld [vmem:[%s797_s1 + $0x40] sm:$0xff]  ;;  %v41_v35 = vld [vmem:[%s797_s1 + $0x48] sm:$0xff]  ;;  %518 = vmatpush3.bf16.msra.mxu1 %v517_v30  ;;  %v520_v38 = vpack.c.bf16 %v145_v32, %v144_v31  ;;  %vm573_vm0 = vmmov 0   ;;  %v574_v63 = vmov 0.0  }
   0xf   :  { %v58_v36 = vld [vmem:[%s797_s1 + $0xd0] sm:$0xff]  ;;  %v59_v37 = vld [vmem:[%s797_s1 + $0xd8] sm:$0xff]  ;;  %519 = vmatprep.subr.bf16.mxu1 %v572_v7  ;;  %v502_v39 = vpack.c.bf16 %v41_v35, %v40_v34  ;;  %v60_v43 = vld [vmem:[%s797_s1 + $0xe0] sm:$0xff]  ;;  %470 = vmatprep.mubr.msk.f32.mxu1 %vm573_vm0, %v574_v63  ;;  %vm157_vm1 = vcmask 523264   ;;  %s575_s9 = smov 8   ;;  %vm243_vm2 = vcmask 261120  }
  0x10   :  { %v504_v40 = vpack.c.bf16 %v59_v37, %v58_v36  ;;  %v42_v41 = vld [vmem:[%s797_s1 + $0x50] sm:$0xff]  ;;  %v43_v42 = vld [vmem:[%s797_s1 + $0x58] sm:$0xff]  ;;  %v61_v44 = vld [vmem:[%s797_s1 + $0xe8] sm:$0xff]  ;;  %vm365_vm4 = vcmask 64512   ;;  %vm374_vm6 = vcmask 130112   ;;  %vm379_vm7 = vcmask 195712  }
  0x11   :  { %499 = vmatpush3.bf16.msra.mxu0 %v498_v29  ;;  %v506_v45 = vpack.c.bf16 %v43_v42, %v42_v41  ;;  %v508_v46 = vpack.c.bf16 %v61_v44, %v60_v43  ;;  %v44_v47 = vld [vmem:[%s797_s1 + $0x60] sm:$0xff]  ;;  %v45_v48 = vld [vmem:[%s797_s1 + $0x68] sm:$0xff]  ;;  %v62_v49 = vld [vmem:[%s797_s1 + $0xf0] sm:$0xff]  ;;  %vm381_vm8 = vcmask 203968   ;;  %vm383_vm9 = vcmask 1047752  }
  0x12   :  { %501 = vmatprep.subr.bf16.mxu0 %v500_v33  ;;  %521 = vmatpush3.bf16.msra.mxu1 %v520_v38  ;;  %v63_v50 = vld [vmem:[%s797_s1 + $0xf8] sm:$0xff]  ;;  %v510_v51 = vpack.c.bf16 %v45_v48, %v44_v47  ;;  %v46_v53 = vld [vmem:[%s797_s1 + $0x70] sm:$0xff]  ;;  %v30_v56 = vld [vmem:[%s796_s0] sm:$0xff] }
  0x13   :  { %522 = vmatprep.subr.bf16.mxu1 %v572_v7  ;;  %v512_v52 = vpack.c.bf16 %v63_v50, %v62_v49  ;;  %v47_v54 = vld [vmem:[%s797_s1 + $0x78] sm:$0xff]  ;;  %v146_v57 = vld [vmem:[%s799_s3 + $0x20] sm:$0xff]  ;;  %v147_v58 = vld [vmem:[%s799_s3 + $0x28] sm:$0xff] }
  0x14   :  { %v514_v55 = vpack.c.bf16 %v47_v54, %v46_v53  ;;  %v523_v59 = vpack.c.bf16 %v147_v58, %v146_v57  ;;  %v148_v60 = vld [vmem:[%s799_s3 + $0x30] sm:$0xff]  ;;  %v149_v61 = vld [vmem:[%s799_s3 + $0x38] sm:$0xff]  ;;  %v399_v1 = vld [vmem:[%s798_s2] ss:$0 sm:$0xff] }
  0x15   :  { %503 = vmatpush3.bf16.msra.mxu0 %v502_v39  ;;  %v526_v62 = vpack.c.bf16 %v149_v61, %v148_v60  ;;  %v232_v4 = vld [vmem:[%s801_s5] sm:$0xff]  ;;  %v233_v5 = vld [vmem:[%s801_s5 + $0x8] sm:$0xff]  ;;  %v234_v10 = vld [vmem:[%s801_s5 + $0x10] sm:$0xff] }
  0x16   :  { %505 = vmatprep.subr.bf16.mxu0 %v504_v40  ;;  %524 = vmatpush3.bf16.msra.mxu1 %v523_v59  ;;  %v529_v8 = vpack.c.bf16 %v233_v5, %v232_v4  ;;  %v235_v11 = vld [vmem:[%s801_s5 + $0x18] sm:$0xff]  ;;  %v321_v13 = vld [vmem:[%s803_s7] sm:$0xff]  ;;  %s576_s7 = smov 120  }
  0x17   :  { %525 = vmatprep.subr.bf16.mxu1 %v572_v7  ;;  %v532_v12 = vpack.c.bf16 %v235_v11, %v234_v10  ;;  %323 = vrot.lane.b32.xlu0 %v321_v13, %s575_s9  ;;  %v402_v18 = vld [vmem:[%s802_s6] ss:$0 sm:$0xff]  ;;  %v332_v35 = vmul.f32 %v321_v13, %v321_v13 }
  0x19   :  { %507 = vmatpush3.bf16.msra.mxu0 %v506_v45  ;;  %v333_v37 = vmul.f32 -0.5, %v332_v35 }
  0x1a   :  { %509 = vmatprep.subr.bf16.mxu0 %v508_v46  ;;  %527 = vmatpush3.bf16.msra.mxu1 %v526_v62 }
  0x1b   :  { %528 = vmatprep.subr.bf16.mxu1 %v572_v7 }
  0x1d   :  { %511 = vmatpush3.bf16.msra.mxu0 %v510_v51 }
  0x1e   :  { %513 = vmatprep.subr.bf16.mxu0 %v512_v52 }
  0x21   :  { %515 = vmatpush3.bf16.msra.mxu0 %v514_v55 }
  0x24   :  { %136 = vmatmul.mubr.f32.vlgmr.msra.gmra.mrb[0].mxu0 %v30_v56 }
  0x89   :  { %v324_v25 = vpop.permute.xlu0 %323 }
  0xf7   :  { %v437_v0 = vpop.f32.mrb[0].mxu0 }
  0xf8   :  { %v438_v2 = vpop.f32.mrb[1].mxu0 }
  0xf9   :  { %v439_v3 = vadd.f32 %v438_v2, %v437_v0 }
  0xfb   :  { %v138_v6 = vadd.f32 %v439_v3, %v399_v1 }
  0xfd   :  { %v141_v9 = vmax.f32 %v138_v6, 0.0 }
  0xff   :  { %471 = vmatmul.mubr.msk.f32.vlgmr.msra.gmra.mrb[0].mxu1 %vm157_vm1, %v141_v9 }
 0x100   :  { %530 = vmatpush3.bf16.msra.mxu1 %v529_v8  ;;  %481 = vmatprep.mubr.msk.f32.mxu1 %vm573_vm0, %v574_v63 }
 0x101   :  { %531 = vmatprep.subr.bf16.mxu1 %v572_v7  ;;  %v400_v7 = vld [vmem:[%s800_s4] ss:$0 sm:$0xff]  ;;  %s577_s4 = smov [#allocation2]  }
 0x102   :  { %s391_s6 = sshll.u32 %s577_s4, 4  ;;  %s392_s6 = int_to_ptr.vmem [resolvable:$true] %s391_s6 }
 0x103   :  { %s548_s13 = scalar_lea.vmem %s392_s6, 128  ;;  %p553_p1 = scmp.lt.s32.totalorder %s392_s6, %s392_s6 }
 0x104   :  { %533 = vmatpush3.bf16.msra.mxu1 %v532_v12  ;;  %p549_p0 = scmp.ne.s32.totalorder %s392_s6, %s548_s13  ;;  %p554_p2 = scmp.lt.s32.totalorder %s548_s13, %s548_s13 }
 0x106   :  { %p555_p3 = por %p554_p2, %p553_p1 }
 0x108   :  { %p556_p4 = pnand %p555_p3, %p549_p0 }
 0x1d2   :  { %v227_v14 = vpop.f32.mrb[0].mxu1 }
 0x1d3   :  { %v228_v15 = vadd.f32 %v400_v7, %v227_v14  ;;  %v472_v16 = vpop.f32.mrb[1].mxu1 }
 0x1d5   :  { %v231_v17 = vmax.f32 %v228_v15, 0.0 }
 0x1d7   :  { %482 = vmatmul.mubr.msk.f32.vlgmr.msra.gmra.mrb[2].mxu1 %vm243_vm2, %v231_v17 }
 0x2aa   :  { %v313_v19 = vpop.f32.mrb[2].mxu1 }
 0x2ab   :  { %v314_v20 = vadd.f32 %v402_v18, %v313_v19  ;;  %v483_v21 = vpop.f32.mrb[3].mxu1 }
 0x2ad   :  { %v317_v22 = vmax.f32 %v314_v20, -10.0 }
 0x2af   :  { %v318_v23 = vmin.f32 %v317_v22, 2.0 }
 0x2b1   :  { %335 = vrot.lane.b32.xlu1 %v318_v23, %s576_s7  ;;  %v319_v24 = vmul.f32 1.442695, %v318_v23 }
 0x2b3   :  { %540 = vpow2.f32 %v319_v24 }
 0x2bd   :  { %v541_v26 = vpop.eup %540 }
 0x2be   :  { %v326_v27 = vmul.f32 %v541_v26, %v324_v25 }
 0x2c0   :  { %328 = vrot.lane.b32.xlu0 %v326_v27, %s576_s7 }
 0x2c4   :  { %371 = vrot.lane.b32.xlu0 %v314_v20, %s575_s9 }
 0x2c8   :  { %376 = vrot.lane.b32.xlu0 %v318_v23, %s575_s9 }
 0x323   :  { %v336_v38 = vpop.permute.xlu1 %335 }
 0x324   :  { %v338_v43 = vsub.f32 %v333_v37, %v336_v38 }
 0x326   :  { %v404_v51 = vadd.f32 -0.9189385, %v338_v43 }
 0x332   :  { %v329_v28 = vpop.permute.xlu0 %328 }
 0x333   :  { %v331_v29 = vadd.f32 %v329_v28, %v314_v20 }
 0x335   :  { %v340_v30 = vand.u32 2147483647, %v331_v29  ;;  %v359_v41 = vsub.f32 0.0, %v331_v29  ;;  %vm347_vm5 = vcmp.ge.f32.partialorder %v331_v29, 0.0  ;;  %v362_v55 = vadd.f32 %v404_v51, %v331_v29 }
 0x336   :  { %v372_v44 = vpop.permute.xlu0 %371 }
 0x337   :  { %v341_v31 = vsub.f32 0.0, %v340_v30  ;;  %v360_v48 = vmax.f32 %v359_v41, 0.0 }
 0x339   :  { %v342_v32 = vmul.f32 1.442695, %v341_v31 }
 0x33a   :  { %v377_v54 = vpop.permute.xlu0 %376 }
 0x33b   :  { %542 = vpow2.f32 %v342_v32 }
 0x345   :  { %v543_v33 = vpop.eup %542 }
 0x346   :  { %v344_v34 = vadd.f32 1.0, %v543_v33  ;;  %v353_v36 = vmul.f32 -0.5, %v543_v33  ;;  %v356_v40 = vand.u32 2147483647, %v543_v33 }
 0x348   :  { %544 = vlog2.f32 %v344_v34  ;;  %v354_v39 = vadd.f32 1.0, %v353_v36  ;;  %vm357_vm3 = vcmp.lt.f32.partialorder %v356_v40, 0.0004427343 }
 0x349   :  { %546 = vrcp.f32 %v344_v34 }
 0x34a   :  { %v355_v47 = vmul.f32 %v543_v33, %v354_v39 }
 0x352   :  { %v545_v42 = vpop.eup %544 }
 0x353   :  { %v547_v45 = vpop.eup %546  ;;  %v352_v46 = vmul.f32 0.6931472, %v545_v42 }
 0x354   :  { %v348_v49 = vmul.f32 %v547_v45, %v543_v33 }
 0x355   :  { %v358_v50 = vsel %vm357_vm3, %v355_v47, %v352_v46 }
 0x356   :  { %v361_v52 = vadd.f32 %v360_v48, %v358_v50  ;;  %v349_v53 = vsel %vm347_vm5, %v547_v45, %v348_v49 }
 0x357   :  { %369 = vst.msk [vmem:[#allocation2] sm:$0xff] %vm365_vm4, %v349_v53 }
 0x358   :  { %v363_v56 = vmul.f32 2.0, %v361_v52  ;;  %375 = vst.msk [vmem:[#allocation2] sm:$0xff] %vm374_vm6, %v372_v44 }
 0x359   :  { %380 = vst.msk [vmem:[#allocation2] sm:$0xff] %vm379_vm7, %v377_v54 }
 0x35a   :  { %v364_v57 = vadd.f32 %v363_v56, %v362_v55 }
 0x35c   :  { %v366_v58 = vsel %vm365_vm4, %v364_v57, 0.0 }
 0x35d   :  { %367 = vadd.xlane.f32.xlu1 %v366_v58 }
 0x3ea   :  { %v368_v59 = vpop.xlane.xlu1 %367 }
 0x3eb   :  { %382 = vst.msk [vmem:[#allocation2] sm:$0xff] %vm381_vm8, %v368_v59 }
 0x3ec   :  { %384 = vst.msk [vmem:[#allocation2] sm:$0xff] %vm383_vm9, %v574_v63 }
 0x3ed   :  { %559 = shalt.err (!%p556_p4)
}
 0x3ee   :  { %s560_s16 = scalar_lea.hbm %s804_s8, 128 }
 0x3ef   :  { %p561_p5 = scmp.ne.s32.totalorder %s804_s8, %s560_s16  ;;  %p564_p6 = scmp.lt.u32.totalorder %s560_s16, %s804_s8 }
 0x3f1   :  { %p566_p7 = pnand %p564_p6, %p561_p5 }
 0x3f3   :  { %569 = shalt.err (!%p566_p7)
}
 0x3f4   :  { %394 = dma.vmem_to_hbm [thread:$0]  %s392_s6, 128, %s804_s8, [#allocation3]  }
 0x3f5   :  { %570 = dma.done.wait [#allocation3], 128  }
 0x3f6   :  { %571 = vsyncadd [#allocation3], 4294967168 }
 0x3f7   :  { %398 = vsyncpa [#allocation3], 1 }

</bundles_post_ra>
